<compile_context>
chip_gen: v7x
topology: tpu7x:2x2x1
jax: 0.10.0
libtpu: 0.0.40
codegen_flags: <defaults>
</compile_context>

<pallas_src>
import functools

import jax
import jax.numpy as jnp
from jax.experimental import pallas as pl
from jax.experimental.pallas import tpu as pltpu


def _quant_act_kernel(thr_ref, w_ref, off_ref, x_ref, o_ref, *, n_thresholds, eps=1e-6):
    # thr_ref: SMEM (n_thresholds,) f32   -- SORTED thresholds
    # w_ref:   SMEM (n_thresholds,) f32   -- fused class-map weights f(i+1) - f(i)
    # off_ref: SMEM (1,) f32              -- f(0)
    # x_ref:   VMEM (S, BLK_F) input dtype
    # o_ref:   VMEM (S, BLK_F) output dtype
    x = x_ref[...].astype(jnp.float32)
    s = x.shape[0]
    inv_nm1 = 1.0 / (s - 1)  # unbiased std; wrapper asserts s >= 2

    # --- normalize_data #1 (mean / unbiased std over seq axis, +eps, clip) ---
    mean = jnp.mean(x, axis=0, keepdims=True)
    xc = x - mean
    var = jnp.sum(xc * xc, axis=0, keepdims=True) * inv_nm1
    inv_std = pl.reciprocal(jnp.sqrt(var) + eps, approx=False)      # (1, BLK_F) only
    xn = jnp.clip(xc * inv_std, -100.0, 100.0)

    # --- fused quantize + (optional) randomize_classes ---
    # q = f(count) with count = #{i : xn > thr_i};  sorted thresholds => prefix indicators.
    q = off_ref[0] + jnp.zeros_like(xn)
    for i in range(n_thresholds):
        q = q + jnp.where(xn > thr_ref[i], w_ref[i], 0.0)

    # --- normalize_data #2 ---
    mean2 = jnp.mean(q, axis=0, keepdims=True)
    qc = q - mean2
    var2 = jnp.sum(qc * qc, axis=0, keepdims=True) * inv_nm1
    inv_std2 = pl.reciprocal(jnp.sqrt(var2) + eps, approx=False)
    o_ref[...] = jnp.clip(qc * inv_std2, -100.0, 100.0).astype(o_ref.dtype)


def _pick_blk_f(seq, ftot, in_bytes, out_bytes, *, max_blk_f=2048,
                vmem_tile_budget=20 * 1024 * 1024):
    """Largest lane tile (multiple of 128) fitting a double-buffer VMEM budget, with >=2
    grid steps when the lane axis allows it (v7x megacore)."""
    lane = 128
    ftot128 = -(-ftot // lane) * lane                       # lane axis padded to 128
    per_lane = 2 * seq * (in_bytes + out_bytes)             # 2 buffers x (in + out) per lane col
    by_vmem = max(lane, (vmem_tile_budget // per_lane) // lane * lane)
    cap = max(lane, min(max_blk_f, by_vmem, ftot128))

    def largest_divisor(upper):
        start = max(lane, (upper // lane) * lane)
        for cand in range(start, lane - 1, -lane):
            if ftot128 % cand == 0:
                return cand
        return lane

    blk = largest_divisor(cap)
    if ftot128 // blk < 2 and ftot128 >= 2 * lane:          # keep >=2 steps for megacore
        blk = largest_divisor(ftot128 // 2)
    return blk, ftot128


def quantization_activation(x, thresholds, perm, reorder_flag, *, max_blk_f=2048):
    """x: (S, B, F). Returns (S, B, F) in x.dtype.  The seq axis (0) is the normalization axis."""
    S, B, F = x.shape
    assert S >= 2, "unbiased std over the sequence axis needs S >= 2"
    Ftot = B * F
    n_thresholds = thresholds.shape[0]

    xf = x.reshape(S, Ftot)                                 # native dtype, upcast in kernel

    # Host side: fold quantize + optional class remap into one weighted threshold pass.
    thr_sorted = jnp.sort(thresholds.astype(jnp.float32))
    perm_f = perm.astype(jnp.float32)
    f_reorder = jnp.concatenate([perm_f, jnp.zeros((1,), jnp.float32)])   # class == n -> 0
    f_identity = jnp.arange(n_thresholds + 1, dtype=jnp.float32)
    fmap = jnp.where(reorder_flag.astype(jnp.int32) > 0, f_reorder, f_identity)
    offset = fmap[:1]                                       # f(0)
    weights = fmap[1:] - fmap[:-1]                          # f(i+1) - f(i)

    in_b = jnp.dtype(x.dtype).itemsize
    out_dtype = x.dtype
    out_b = jnp.dtype(out_dtype).itemsize
    blk_f, ftot_pad = _pick_blk_f(S, Ftot, in_b, out_b, max_blk_f=max_blk_f)
    if ftot_pad != Ftot:
        xf = jnp.pad(xf, ((0, 0), (0, ftot_pad - Ftot)))    # inert zero columns

    kernel = functools.partial(_quant_act_kernel, n_thresholds=n_thresholds)
    out = pl.pallas_call(
        kernel,
        out_shape=jax.ShapeDtypeStruct((S, ftot_pad), out_dtype),
        grid=(ftot_pad // blk_f,),
        in_specs=[
            pl.BlockSpec(memory_space=pltpu.MemorySpace.SMEM),   # sorted thresholds
            pl.BlockSpec(memory_space=pltpu.MemorySpace.SMEM),   # fused weights
            pl.BlockSpec(memory_space=pltpu.MemorySpace.SMEM),   # offset f(0)
            pl.BlockSpec((S, blk_f), lambda j: (0, j)),           # x tile (full seq extent)
        ],
        out_specs=pl.BlockSpec((S, blk_f), lambda j: (0, j)),
        compiler_params=pltpu.CompilerParams(
            dimension_semantics=("parallel",),
            vmem_limit_bytes=32 * 1024 * 1024,
        ),
    )(thr_sorted, weights, offset, xf)

    if ftot_pad != Ftot:
        out = out[:, :Ftot]
    return out.reshape(S, B, F)


def _reference_jax(x, thresholds, perm, reorder_flag, eps=1e-6):
    """Pure-JAX mirror of the PyTorch forward (NaN-free inputs)."""
    def norm(v):
        mean = jnp.mean(v, axis=0, keepdims=True)
        std = jnp.std(v, axis=0, ddof=1, keepdims=True) + eps
        return jnp.clip((v - mean) / std, -100.0, 100.0)

    xn = norm(x.astype(jnp.float32))
    q = jnp.sum(xn[..., None] > thresholds.astype(jnp.float32), axis=-1).astype(jnp.float32)
    classes = jnp.arange(thresholds.shape[0], dtype=jnp.float32)
    remapped = jnp.sum((q[..., None] == classes) * perm.astype(jnp.float32), axis=-1)
    q = jnp.where(reorder_flag > 0, remapped, q)
    return norm(q)


if __name__ == "__main__":
    key = jax.random.PRNGKey(0)
    k_thr, k_x, k_perm, k_flag, k_x2 = jax.random.split(key, 5)

    # Module params (deterministic stand-in for torch.randn / random.random / randperm)
    n_thresholds = 8
    reorder_p = 0.5
    thresholds = jax.random.normal(k_thr, (n_thresholds,), dtype=jnp.float32)
    perm = jax.random.permutation(k_perm, n_thresholds).astype(jnp.float32)
    reorder_flag = (jax.random.uniform(k_flag, ()) < reorder_p).astype(jnp.int32)

    # Config A: aligned lane count (seq=64, batch=4, features=32), sampled flag.
    S, B, F = 64, 4, 32
    x = jax.random.normal(k_x, (S, B, F), dtype=jnp.float32)
    out = quantization_activation(x, thresholds, perm, reorder_flag)
    jax.block_until_ready(out)
    assert out.shape == (S, B, F) and out.dtype == jnp.float32
    ref = _reference_jax(x, thresholds, perm, reorder_flag)
    frac_bad = float(jnp.mean((jnp.abs(out - ref) > 1e-3).astype(jnp.float32)))
    assert frac_bad < 0.02, f"config A mismatch fraction {frac_bad}"

    # Config B: ragged lane count (exercises padding + megacore split) and the other flag branch.
    S2, B2, F2 = 32, 3, 50
    x2 = jax.random.normal(k_x2, (S2, B2, F2), dtype=jnp.float32)
    flag2 = (1 - reorder_flag).astype(jnp.int32)
    out2 = quantization_activation(x2, thresholds, perm, flag2)
    jax.block_until_ready(out2)
    assert out2.shape == (S2, B2, F2) and out2.dtype == jnp.float32
    ref2 = _reference_jax(x2, thresholds, perm, flag2)
    frac_bad2 = float(jnp.mean((jnp.abs(out2 - ref2) > 1e-3).astype(jnp.float32)))
    assert frac_bad2 < 0.02, f"config B mismatch fraction {frac_bad2}"

    print("KERNEL_OK")
</pallas_src>

<mosaic_0001>
module attributes {stable_mosaic.version = 11 : i64} {
  func.func @_quant_act_kernel(%arg0: i32, %arg1: memref<8xf32, #tpu.memory_space<smem>>, %arg2: memref<8xf32, #tpu.memory_space<smem>>, %arg3: memref<1xf32, #tpu.memory_space<smem>>, %arg4: memref<64x128xf32, #tpu.memory_space<vmem>>, %arg5: memref<64x128xf32, #tpu.memory_space<vmem>>) attributes {dimension_semantics = [#tpu.dimension_semantics<parallel>], iteration_bounds = array<i64: 1>, scalar_prefetch = 0 : i64, scratch_operands = 0 : i64, tpu.core_type = #tpu.core_type<tc>, window_params = [{transform_indices = @transform_0, window_bounds = array<i64: 8>}, {transform_indices = @transform_1, window_bounds = array<i64: 8>}, {transform_indices = @transform_2, window_bounds = array<i64: 1>}, {transform_indices = @transform_3, window_bounds = array<i64: 64, 128>}, {transform_indices = @transform_4, window_bounds = array<i64: 64, 128>}]} {
    %c0 = arith.constant 0 : index
    %c0_0 = arith.constant 0 : index
    %0 = vector.load %arg4[%c0, %c0_0] : memref<64x128xf32, #tpu.memory_space<vmem>>, vector<64x128xf32>
    %cst = arith.constant dense<0.000000e+00> : vector<128xf32>
    %1 = vector.multi_reduction <add>, %0, %cst [0] : vector<64x128xf32> to vector<128xf32>
    %2 = vector.shape_cast %1 : vector<128xf32> to vector<1x128xf32>
    %cst_1 = arith.constant 6.400000e+01 : f32
    %3 = vector.broadcast %cst_1 : f32 to vector<1x128xf32>
    %4 = arith.divf %2, %3 : vector<1x128xf32>
    %5 = vector.broadcast %4 : vector<1x128xf32> to vector<64x128xf32>
    %6 = arith.subf %0, %5 : vector<64x128xf32>
    %7 = arith.mulf %6, %6 : vector<64x128xf32>
    %cst_2 = arith.constant dense<0.000000e+00> : vector<128xf32>
    %8 = vector.multi_reduction <add>, %7, %cst_2 [0] : vector<64x128xf32> to vector<128xf32>
    %9 = vector.shape_cast %8 : vector<128xf32> to vector<1x128xf32>
    %cst_3 = arith.constant 0.0158730168 : f32
    %10 = vector.broadcast %cst_3 : f32 to vector<1x128xf32>
    %11 = arith.mulf %9, %10 : vector<1x128xf32>
    %12 = math.sqrt %11 : vector<1x128xf32>
    %cst_4 = arith.constant 9.99999997E-7 : f32
    %13 = vector.broadcast %cst_4 : f32 to vector<1x128xf32>
    %14 = arith.addf %12, %13 : vector<1x128xf32>
    %15 = tpu.reciprocal %14 : vector<1x128xf32> -> vector<1x128xf32>
    %16 = vector.broadcast %15 : vector<1x128xf32> to vector<64x128xf32>
    %17 = arith.mulf %6, %16 : vector<64x128xf32>
    %cst_5 = arith.constant -1.000000e+02 : f32
    %cst_6 = arith.constant 1.000000e+02 : f32
    %18 = vector.broadcast %cst_5 : f32 to vector<64x128xf32>
    %19 = arith.maximumf %18, %17 : vector<64x128xf32>
    %20 = vector.broadcast %cst_6 : f32 to vector<64x128xf32>
    %21 = arith.minimumf %20, %19 : vector<64x128xf32>
    %c0_7 = arith.constant 0 : index
    %22 = memref.load %arg3[%c0_7] : memref<1xf32, #tpu.memory_space<smem>>
    %cst_8 = arith.constant 0.000000e+00 : f32
    %23 = vector.broadcast %cst_8 : f32 to vector<64x128xf32>
    %24 = vector.broadcast %22 : f32 to vector<64x128xf32>
    %25 = arith.addf %24, %23 : vector<64x128xf32>
    %c0_9 = arith.constant 0 : index
    %26 = memref.load %arg1[%c0_9] : memref<8xf32, #tpu.memory_space<smem>>
    %27 = vector.broadcast %26 : f32 to vector<64x128xf32>
    %28 = arith.cmpf ogt, %21, %27 : vector<64x128xf32>
    %c0_10 = arith.constant 0 : index
    %29 = memref.load %arg2[%c0_10] : memref<8xf32, #tpu.memory_space<smem>>
    %cst_11 = arith.constant 0.000000e+00 : f32
    %30 = vector.broadcast %29 : f32 to vector<64x128xf32>
    %31 = vector.broadcast %cst_11 : f32 to vector<64x128xf32>
    %32 = arith.select %28, %30, %31 : vector<64x128xi1>, vector<64x128xf32>
    %33 = arith.addf %25, %32 : vector<64x128xf32>
    %c1 = arith.constant 1 : index
    %34 = memref.load %arg1[%c1] : memref<8xf32, #tpu.memory_space<smem>>
    %35 = vector.broadcast %34 : f32 to vector<64x128xf32>
    %36 = arith.cmpf ogt, %21, %35 : vector<64x128xf32>
    %c1_12 = arith.constant 1 : index
    %37 = memref.load %arg2[%c1_12] : memref<8xf32, #tpu.memory_space<smem>>
    %cst_13 = arith.constant 0.000000e+00 : f32
    %38 = vector.broadcast %37 : f32 to vector<64x128xf32>
    %39 = vector.broadcast %cst_13 : f32 to vector<64x128xf32>
    %40 = arith.select %36, %38, %39 : vector<64x128xi1>, vector<64x128xf32>
    %41 = arith.addf %33, %40 : vector<64x128xf32>
    %c2 = arith.constant 2 : index
    %42 = memref.load %arg1[%c2] : memref<8xf32, #tpu.memory_space<smem>>
    %43 = vector.broadcast %42 : f32 to vector<64x128xf32>
    %44 = arith.cmpf ogt, %21, %43 : vector<64x128xf32>
    %c2_14 = arith.constant 2 : index
    %45 = memref.load %arg2[%c2_14] : memref<8xf32, #tpu.memory_space<smem>>
    %cst_15 = arith.constant 0.000000e+00 : f32
    %46 = vector.broadcast %45 : f32 to vector<64x128xf32>
    %47 = vector.broadcast %cst_15 : f32 to vector<64x128xf32>
    %48 = arith.select %44, %46, %47 : vector<64x128xi1>, vector<64x128xf32>
    %49 = arith.addf %41, %48 : vector<64x128xf32>
    %c3 = arith.constant 3 : index
    %50 = memref.load %arg1[%c3] : memref<8xf32, #tpu.memory_space<smem>>
    %51 = vector.broadcast %50 : f32 to vector<64x128xf32>
    %52 = arith.cmpf ogt, %21, %51 : vector<64x128xf32>
    %c3_16 = arith.constant 3 : index
    %53 = memref.load %arg2[%c3_16] : memref<8xf32, #tpu.memory_space<smem>>
    %cst_17 = arith.constant 0.000000e+00 : f32
    %54 = vector.broadcast %53 : f32 to vector<64x128xf32>
    %55 = vector.broadcast %cst_17 : f32 to vector<64x128xf32>
    %56 = arith.select %52, %54, %55 : vector<64x128xi1>, vector<64x128xf32>
    %57 = arith.addf %49, %56 : vector<64x128xf32>
    %c4 = arith.constant 4 : index
    %58 = memref.load %arg1[%c4] : memref<8xf32, #tpu.memory_space<smem>>
    %59 = vector.broadcast %58 : f32 to vector<64x128xf32>
    %60 = arith.cmpf ogt, %21, %59 : vector<64x128xf32>
    %c4_18 = arith.constant 4 : index
    %61 = memref.load %arg2[%c4_18] : memref<8xf32, #tpu.memory_space<smem>>
    %cst_19 = arith.constant 0.000000e+00 : f32
    %62 = vector.broadcast %61 : f32 to vector<64x128xf32>
    %63 = vector.broadcast %cst_19 : f32 to vector<64x128xf32>
    %64 = arith.select %60, %62, %63 : vector<64x128xi1>, vector<64x128xf32>
    %65 = arith.addf %57, %64 : vector<64x128xf32>
    %c5 = arith.constant 5 : index
    %66 = memref.load %arg1[%c5] : memref<8xf32, #tpu.memory_space<smem>>
    %67 = vector.broadcast %66 : f32 to vector<64x128xf32>
    %68 = arith.cmpf ogt, %21, %67 : vector<64x128xf32>
    %c5_20 = arith.constant 5 : index
    %69 = memref.load %arg2[%c5_20] : memref<8xf32, #tpu.memory_space<smem>>
    %cst_21 = arith.constant 0.000000e+00 : f32
    %70 = vector.broadcast %69 : f32 to vector<64x128xf32>
    %71 = vector.broadcast %cst_21 : f32 to vector<64x128xf32>
    %72 = arith.select %68, %70, %71 : vector<64x128xi1>, vector<64x128xf32>
    %73 = arith.addf %65, %72 : vector<64x128xf32>
    %c6 = arith.constant 6 : index
    %74 = memref.load %arg1[%c6] : memref<8xf32, #tpu.memory_space<smem>>
    %75 = vector.broadcast %74 : f32 to vector<64x128xf32>
    %76 = arith.cmpf ogt, %21, %75 : vector<64x128xf32>
    %c6_22 = arith.constant 6 : index
    %77 = memref.load %arg2[%c6_22] : memref<8xf32, #tpu.memory_space<smem>>
    %cst_23 = arith.constant 0.000000e+00 : f32
    %78 = vector.broadcast %77 : f32 to vector<64x128xf32>
    %79 = vector.broadcast %cst_23 : f32 to vector<64x128xf32>
    %80 = arith.select %76, %78, %79 : vector<64x128xi1>, vector<64x128xf32>
    %81 = arith.addf %73, %80 : vector<64x128xf32>
    %c7 = arith.constant 7 : index
    %82 = memref.load %arg1[%c7] : memref<8xf32, #tpu.memory_space<smem>>
    %83 = vector.broadcast %82 : f32 to vector<64x128xf32>
    %84 = arith.cmpf ogt, %21, %83 : vector<64x128xf32>
    %c7_24 = arith.constant 7 : index
    %85 = memref.load %arg2[%c7_24] : memref<8xf32, #tpu.memory_space<smem>>
    %cst_25 = arith.constant 0.000000e+00 : f32
    %86 = vector.broadcast %85 : f32 to vector<64x128xf32>
    %87 = vector.broadcast %cst_25 : f32 to vector<64x128xf32>
    %88 = arith.select %84, %86, %87 : vector<64x128xi1>, vector<64x128xf32>
    %89 = arith.addf %81, %88 : vector<64x128xf32>
    %cst_26 = arith.constant dense<0.000000e+00> : vector<128xf32>
    %90 = vector.multi_reduction <add>, %89, %cst_26 [0] : vector<64x128xf32> to vector<128xf32>
    %91 = vector.shape_cast %90 : vector<128xf32> to vector<1x128xf32>
    %cst_27 = arith.constant 6.400000e+01 : f32
    %92 = vector.broadcast %cst_27 : f32 to vector<1x128xf32>
    %93 = arith.divf %91, %92 : vector<1x128xf32>
    %94 = vector.broadcast %93 : vector<1x128xf32> to vector<64x128xf32>
    %95 = arith.subf %89, %94 : vector<64x128xf32>
    %96 = arith.mulf %95, %95 : vector<64x128xf32>
    %cst_28 = arith.constant dense<0.000000e+00> : vector<128xf32>
    %97 = vector.multi_reduction <add>, %96, %cst_28 [0] : vector<64x128xf32> to vector<128xf32>
    %98 = vector.shape_cast %97 : vector<128xf32> to vector<1x128xf32>
    %cst_29 = arith.constant 0.0158730168 : f32
    %99 = vector.broadcast %cst_29 : f32 to vector<1x128xf32>
    %100 = arith.mulf %98, %99 : vector<1x128xf32>
    %101 = math.sqrt %100 : vector<1x128xf32>
    %cst_30 = arith.constant 9.99999997E-7 : f32
    %102 = vector.broadcast %cst_30 : f32 to vector<1x128xf32>
    %103 = arith.addf %101, %102 : vector<1x128xf32>
    %104 = tpu.reciprocal %103 : vector<1x128xf32> -> vector<1x128xf32>
    %105 = vector.broadcast %104 : vector<1x128xf32> to vector<64x128xf32>
    %106 = arith.mulf %95, %105 : vector<64x128xf32>
    %cst_31 = arith.constant -1.000000e+02 : f32
    %cst_32 = arith.constant 1.000000e+02 : f32
    %107 = vector.broadcast %cst_31 : f32 to vector<64x128xf32>
    %108 = arith.maximumf %107, %106 : vector<64x128xf32>
    %109 = vector.broadcast %cst_32 : f32 to vector<64x128xf32>
    %110 = arith.minimumf %109, %108 : vector<64x128xf32>
    %c0_33 = arith.constant 0 : index
    %c0_34 = arith.constant 0 : index
    %111 = vector.load %arg5[%c0_33, %c0_34] : memref<64x128xf32, #tpu.memory_space<vmem>>, vector<64x128xf32>
    tpu.vector_store %arg5[%c0_33, %c0_34], %110 {strides = array<i32>} : memref<64x128xf32, #tpu.memory_space<vmem>>, vector<64x128xf32>,
    return
  }
  func.func @transform_0(%arg0: i32) -> i32 {
    %c0_i32 = arith.constant 0 : i32
    %c0_i32_0 = arith.constant 0 : i32
    return %c0_i32 : i32
  }
  func.func @transform_1(%arg0: i32) -> i32 {
    %c0_i32 = arith.constant 0 : i32
    %c0_i32_0 = arith.constant 0 : i32
    return %c0_i32 : i32
  }
  func.func @transform_2(%arg0: i32) -> i32 {
    %c0_i32 = arith.constant 0 : i32
    %c0_i32_0 = arith.constant 0 : i32
    return %c0_i32 : i32
  }
  func.func @transform_3(%arg0: i32) -> (i32, i32) {
    %c0_i32 = arith.constant 0 : i32
    %c0_i32_0 = arith.constant 0 : i32
    return %c0_i32, %arg0 : i32, i32
  }
  func.func @transform_4(%arg0: i32) -> (i32, i32) {
    %c0_i32 = arith.constant 0 : i32
    %c0_i32_0 = arith.constant 0 : i32
    return %c0_i32, %arg0 : i32, i32
  }
}

</mosaic_0001>

<bundles_post_ra>
// kernel: tpu_custom_call.1
= control target key start
LH: loop header
LB: loop body
LE: loop exit
PB: predicated region body
PF: predicated region fallthrough
CT: control target
= control target key end

     0   :  { %10 = vsyncpa [#allocation6], 0  ;;  %s933_s0 = inlined_call_operand.vmem [shape: f32[8], index: 0, kind: input, shape index: {}]   ;;  %s934_s1 = inlined_call_operand.vmem [shape: f32[8], index: 1, kind: input, shape index: {}]   ;;  %s935_s2 = inlined_call_operand.<no memory space> [shape: f32[1], index: 2, kind: input, shape index: {}]   ;;  %s936_s3 = inlined_call_operand.hbm [shape: f32[64,128], index: 3, kind: input, shape index: {}]   ;;  %s937_s4 = inlined_call_operand.hbm [shape: f32[64,128], index: 4, kind: output, shape index: {}]  }
   0x1   :  { %11 = vsyncpa [#allocation8], 0 }
   0x2   :  { %12 = vsyncpa [#allocation4], 0 }
   0x3   :  { %13 = vsyncpa [#allocation5], 0  ;;  %s20_s17 = sshll.u32 %s933_s0, 4  ;;  %s30_s20 = sshll.u32 %s934_s1, 4  ;;  %s21_s17 = int_to_ptr.vmem [resolvable:$true] %s20_s17  ;;  %s31_s20 = int_to_ptr.vmem [resolvable:$true] %s30_s20 }
   0x4   :  { %s519_s21 = scalar_lea.vmem %s21_s17, 16  ;;  %p524_p1 = scmp.lt.s32.totalorder %s21_s17, %s21_s17 }
   0x5   :  { %p520_p0 = scmp.ne.s32.totalorder %s21_s17, %s519_s21  ;;  %p525_p2 = scmp.lt.s32.totalorder %s519_s21, %s519_s21 }
   0x7   :  { %p526_p3 = por %p525_p2, %p524_p1 }
   0x9   :  { %p527_p4 = pnand %p526_p3, %p520_p0 }
   0xb   :  { %530 = shalt.err (!%p527_p4)
}
   0xc   :  { %s595_s22 = smov [#allocation3]   ;;  %s531_s23 = scalar_lea.vmem %s31_s20, 16 }
   0xd   :  { %23 = dma.vmem_to_smem %s21_s17, 16, %s595_s22, [#allocation6]  }
   0xe   :  { %p532_p5 = scmp.ne.s32.totalorder %s31_s20, %s531_s23  ;;  %p536_p6 = scmp.lt.s32.totalorder %s31_s20, %s31_s20 }
   0xf   :  { %p537_p7 = scmp.lt.s32.totalorder %s531_s23, %s531_s23 }
  0x11   :  { %p538_p8 = por %p537_p7, %p536_p6 }
  0x13   :  { %p539_p9 = pnand %p538_p8, %p532_p5 }
  0x15   :  { %542 = shalt.err (!%p539_p9)
}
  0x16   :  { %s596_s0 = smov [#allocation7]   ;;  %s597_s1 = smov [#allocation9]  }
  0x17   :  { %33 = dma.vmem_to_smem %s31_s20, 16, %s596_s0, [#allocation8]  }
  0x18   :  { %s41_s24 = sshll.u32 %s597_s1, 4  ;;  %s543_s27 = scalar_lea.hbm %s936_s3, 1024  ;;  %s42_s24 = int_to_ptr.vmem [resolvable:$true] %s41_s24 }
  0x19   :  { %p544_p10 = scmp.ne.s32.totalorder %s936_s3, %s543_s27  ;;  %p547_p11 = scmp.lt.u32.totalorder %s543_s27, %s936_s3 }
  0x1b   :  { %p549_p12 = pnand %p547_p11, %p544_p10 }
  0x1d   :  { %552 = shalt.err (!%p549_p12)
}
  0x1e   :  { %s553_s6 = scalar_lea.vmem %s42_s24, 1024  ;;  %p558_p0 = scmp.lt.s32.totalorder %s42_s24, %s42_s24 }
  0x1f   :  { %p554_p13 = scmp.ne.s32.totalorder %s42_s24, %s553_s6  ;;  %p559_p1 = scmp.lt.s32.totalorder %s553_s6, %s553_s6 }
  0x21   :  { %p560_p2 = por %p559_p1, %p558_p0 }
  0x23   :  { %p561_p3 = pnand %p560_p2, %p554_p13 }
  0x25   :  { %564 = shalt.err (!%p561_p3)
}
  0x26   :  { %s598_s7 = smov 128   ;;  %s599_s8 = smov 8  }
  0x27   :  { %47 = dma.hbm_to_vmem [thread:$0]  %s936_s3, 1024, %s42_s24, [#allocation4], %s598_s7, %s598_s7, %s599_s8  }
  0x28   :  { %587 = dma.done.wait [#allocation6], 16  }
  0x29   :  { %588 = vsyncadd [#allocation6], 4294967280 }
  0x2a   :  { %589 = dma.done.wait [#allocation8], 16  }
  0x2b   :  { %590 = vsyncadd [#allocation8], 4294967280 }
  0x2c   :  { %591 = dma.done.wait [#allocation4], 1024  }
  0x2d   :  { %592 = vsyncadd [#allocation4], 4294966272 }
  0x2e   :  { %57 = sfence }
  0x2f   :  { %v58_v0 = vld [vmem:[#allocation9] sm:$0xff]  ;;  %v59_v1 = vld [vmem:[#allocation9 + $0x8] sm:$0xff]  ;;  %v60_v2 = vld [vmem:[#allocation9 + $0x10] sm:$0xff]  ;;  %s147_s3 = sld [smem:[#allocation3]]  ;;  %s483_s12 = sld [smem:[#allocation3 + $0x1]]  ;;  %v666_v59 = vstv %s935_s2 }
  0x30   :  { %v66_v3 = vadd.f32 %v59_v1, %v58_v0  ;;  %v61_v4 = vld [vmem:[#allocation9 + $0x18] sm:$0xff]  ;;  %v62_v6 = vld [vmem:[#allocation9 + $0x20] sm:$0xff]  ;;  %v63_v8 = vld [vmem:[#allocation9 + $0x28] sm:$0xff]  ;;  %s157_s11 = sld [smem:[#allocation7]]  ;;  %s484_s13 = sld [smem:[#allocation7 + $0x1]] }
  0x31   :  { %v64_v10 = vld [vmem:[#allocation9 + $0x30] sm:$0xff]  ;;  %v65_v12 = vld [vmem:[#allocation9 + $0x38] sm:$0xff]  ;;  %s647_s14 = sld [smem:[#allocation3 + $0x2]]  ;;  %s651_s16 = sld [smem:[#allocation3 + $0x3]] }
  0x32   :  { %v67_v5 = vadd.f32 %v66_v3, %v60_v2  ;;  %s649_s15 = sld [smem:[#allocation7 + $0x2]]  ;;  %s653_s17 = sld [smem:[#allocation7 + $0x3]] }
  0x33   :  { %s655_s18 = sld [smem:[#allocation3 + $0x4]]  ;;  %s659_s20 = sld [smem:[#allocation3 + $0x5]] }
  0x34   :  { %v68_v7 = vadd.f32 %v67_v5, %v61_v4  ;;  %s657_s19 = sld [smem:[#allocation7 + $0x4]]  ;;  %s661_s21 = sld [smem:[#allocation7 + $0x5]] }
  0x35   :  { %v148_v60 = vstv %s147_s3  ;;  %v668_v62 = vstv %s483_s12  ;;  %s670_s0 = sld [smem:[#allocation3 + $0x6]]  ;;  %s674_s24 = sld [smem:[#allocation3 + $0x7]] }
  0x36   :  { %v69_v9 = vadd.f32 %v68_v7, %v62_v6  ;;  %v158_v61 = vstv %s157_s11  ;;  %s672_s1 = sld [smem:[#allocation7 + $0x6]]  ;;  %s676_s2 = sld [smem:[#allocation7 + $0x7]] }
  0x37   :  { %s600_s25 = smov [#allocation10]  }
  0x38   :  { %v70_v11 = vadd.f32 %v69_v9, %v63_v8  ;;  %s461_s26 = sshll.u32 %s600_s25, 4  ;;  %s462_s26 = int_to_ptr.vmem [resolvable:$true] %s461_s26 }
  0x39   :  { %s565_s27 = scalar_lea.vmem %s462_s26, 1024  ;;  %p570_p5 = scmp.lt.s32.totalorder %s462_s26, %s462_s26 }
  0x3a   :  { %v71_v13 = vadd.f32 %v70_v11, %v64_v10  ;;  %p566_p4 = scmp.ne.s32.totalorder %s462_s26, %s565_s27  ;;  %p571_p6 = scmp.lt.s32.totalorder %s565_s27, %s565_s27 }
  0x3c   :  { %v72_v14 = vadd.f32 %v71_v13, %v65_v12  ;;  %p572_p7 = por %p571_p6, %p570_p5 }
  0x3e   :  { %v73_v15 = vrot.slane %v72_v14, 4  ;;  %p573_p8 = pnand %p572_p7, %p566_p4 }
  0x40   :  { %v74_v16 = vadd.f32 %v73_v15, %v72_v14 }
  0x42   :  { %v75_v17 = vrot.slane %v74_v16, 2 }
  0x44   :  { %v76_v18 = vadd.f32 %v75_v17, %v74_v16  ;;  %v695_v16 = vstv %s647_s14  ;;  %v698_v17 = vstv %s649_s15 }
  0x46   :  { %v77_v19 = vrot.slane %v76_v18, 1 }
  0x48   :  { %v78_v20 = vadd.f32 %v77_v19, %v76_v18  ;;  %v701_v18 = vstv %s651_s16  ;;  %v704_v19 = vstv %s653_s17 }
  0x4a   :  { %v80_v21 = vmul.f32 0.015625, %v78_v20  ;;  %v707_v20 = vstv %s655_s18 }
  0x4c   :  { %v81_v22 = vsub.f32 %v58_v0, %v80_v21  ;;  %v82_v23 = vsub.f32 %v59_v1, %v80_v21  ;;  %v83_v24 = vsub.f32 %v60_v2, %v80_v21  ;;  %v84_v25 = vsub.f32 %v61_v4, %v80_v21 }
  0x4d   :  { %v85_v26 = vsub.f32 %v62_v6, %v80_v21  ;;  %v86_v30 = vsub.f32 %v63_v8, %v80_v21  ;;  %v87_v33 = vsub.f32 %v64_v10, %v80_v21  ;;  %v88_v36 = vsub.f32 %v65_v12, %v80_v21 }
  0x4e   :  { %v89_v27 = vmul.f32 %v81_v22, %v81_v22  ;;  %v90_v28 = vmul.f32 %v82_v23, %v82_v23  ;;  %v91_v29 = vmul.f32 %v83_v24, %v83_v24  ;;  %v92_v31 = vmul.f32 %v84_v25, %v84_v25 }
  0x4f   :  { %v93_v34 = vmul.f32 %v85_v26, %v85_v26  ;;  %v94_v37 = vmul.f32 %v86_v30, %v86_v30  ;;  %v95_v39 = vmul.f32 %v87_v33, %v87_v33  ;;  %v96_v41 = vmul.f32 %v88_v36, %v88_v36 }
  0x50   :  { %v97_v32 = vadd.f32 %v90_v28, %v89_v27  ;;  %v186_v10 = vstv %s484_s13  ;;  %v710_v21 = vstv %s657_s19 }
  0x52   :  { %v98_v35 = vadd.f32 %v97_v32, %v91_v29 }
  0x54   :  { %v99_v38 = vadd.f32 %v98_v35, %v92_v31 }
  0x56   :  { %v100_v40 = vadd.f32 %v99_v38, %v93_v34 }
  0x58   :  { %v101_v42 = vadd.f32 %v100_v40, %v94_v37 }
  0x5a   :  { %v102_v43 = vadd.f32 %v101_v42, %v95_v39 }
  0x5c   :  { %v103_v44 = vadd.f32 %v102_v43, %v96_v41 }
  0x5e   :  { %v104_v45 = vrot.slane %v103_v44, 4 }
  0x60   :  { %v105_v46 = vadd.f32 %v104_v45, %v103_v44 }
  0x62   :  { %v106_v47 = vrot.slane %v105_v46, 2 }
  0x64   :  { %v107_v48 = vadd.f32 %v106_v47, %v105_v46 }
  0x66   :  { %v108_v49 = vrot.slane %v107_v48, 1 }
  0x68   :  { %v109_v50 = vadd.f32 %v108_v49, %v107_v48 }
  0x6a   :  { %v110_v51 = vmul.f32 0.015873017, %v109_v50 }
  0x6c   :  { %511 = vrsqrt.f32 %v110_v51  ;;  %vm113_vm0 = vcmp.eq.f32.partialorder %v110_v51, inf  ;;  %v116_v53 = vand.u32 2147483648, %v110_v51  ;;  %vm115_vm1 = vcmp.eq.f32.partialorder %v110_v51, 0.0 }
  0x76   :  { %v512_v52 = vpop.eup %511 }
  0x77   :  { %v112_v54 = vmul.f32 %v512_v52, %v110_v51 }
  0x79   :  { %v114_v55 = vsel %vm113_vm0, %v110_v51, %v112_v54 }
  0x7a   :  { %v117_v56 = vsel %vm115_vm1, %v116_v53, %v114_v55 }
  0x7b   :  { %v118_v57 = vadd.f32 1e-06, %v117_v56 }
  0x7d   :  { %513 = vrcp.f32 %v118_v57 }
  0x87   :  { %v514_v58 = vpop.eup %513 }
  0x88   :  { %v120_v63 = vmul.f32 %v514_v58, %v81_v22  ;;  %v121_v0 = vmul.f32 %v514_v58, %v82_v23  ;;  %v122_v1 = vmul.f32 %v514_v58, %v83_v24  ;;  %v123_v2 = vmul.f32 %v514_v58, %v84_v25 }
  0x89   :  { %v124_v3 = vmul.f32 %v514_v58, %v85_v26  ;;  %v125_v4 = vmul.f32 %v514_v58, %v86_v30  ;;  %v126_v5 = vmul.f32 %v514_v58, %v87_v33  ;;  %v127_v6 = vmul.f32 %v514_v58, %v88_v36 }
  0x8a   :  { %v678_v7 = vclamps-f32 %v120_v63, 100.0  ;;  %v680_v8 = vclamps-f32 %v121_v0, 100.0  ;;  %v682_v9 = vclamps-f32 %v122_v1, 100.0  ;;  %v684_v11 = vclamps-f32 %v123_v2, 100.0 }
  0x8b   :  { %v686_v12 = vclamps-f32 %v124_v3, 100.0  ;;  %v688_v13 = vclamps-f32 %v125_v4, 100.0  ;;  %v690_v14 = vclamps-f32 %v126_v5, 100.0  ;;  %v692_v15 = vclamps-f32 %v127_v6, 100.0 }
  0x8c   :  { %v713_v22 = vstv %s659_s20  ;;  %vm149_vm2 = vcmp.gt.f32.partialorder %v678_v7, %v148_v60  ;;  %vm150_vm3 = vcmp.gt.f32.partialorder %v680_v8, %v148_v60  ;;  %vm151_vm4 = vcmp.gt.f32.partialorder %v682_v9, %v148_v60 }
  0x8d   :  { %v719_v23 = vstv %s661_s21  ;;  %vm152_vm5 = vcmp.gt.f32.partialorder %v684_v11, %v148_v60  ;;  %vm153_vm6 = vcmp.gt.f32.partialorder %v686_v12, %v148_v60  ;;  %vm154_vm7 = vcmp.gt.f32.partialorder %v688_v13, %v148_v60 }
  0x8e   :  { %vm155_vm8 = vcmp.gt.f32.partialorder %v690_v14, %v148_v60  ;;  %vm156_vm9 = vcmp.gt.f32.partialorder %v692_v15, %v148_v60  ;;  %v727_v24 = vstv %s670_s0  ;;  %v730_v25 = vstv %s672_s1 }
  0x8f   :  { %v733_v26 = vstv %s674_s24  ;;  %v159_v27 = vsel %vm149_vm2, %v158_v61, 0.0  ;;  %v160_v28 = vsel %vm150_vm3, %v158_v61, 0.0  ;;  %v161_v29 = vsel %vm151_vm4, %v158_v61, 0.0 }
  0x90   :  { %v736_v30 = vstv %s676_s2  ;;  %v162_v31 = vsel %vm152_vm5, %v158_v61, 0.0  ;;  %v163_v32 = vsel %vm153_vm6, %v158_v61, 0.0  ;;  %v164_v33 = vsel %vm154_vm7, %v158_v61, 0.0 }
  0x91   :  { %v165_v34 = vsel %vm155_vm8, %v158_v61, 0.0  ;;  %v166_v35 = vsel %vm156_vm9, %v158_v61, 0.0  ;;  %vm177_vm10 = vcmp.gt.f32.partialorder %v678_v7, %v668_v62  ;;  %vm178_vm11 = vcmp.gt.f32.partialorder %v680_v8, %v668_v62 }
  0x92   :  { %vm179_vm12 = vcmp.gt.f32.partialorder %v682_v9, %v668_v62  ;;  %v167_v36 = vadd.f32 %v159_v27, %v666_v59  ;;  %v168_v37 = vadd.f32 %v160_v28, %v666_v59  ;;  %v169_v38 = vadd.f32 %v161_v29, %v666_v59 }
  0x93   :  { %vm180_vm13 = vcmp.gt.f32.partialorder %v684_v11, %v668_v62  ;;  %v170_v39 = vadd.f32 %v162_v31, %v666_v59  ;;  %vm181_vm14 = vcmp.gt.f32.partialorder %v686_v12, %v668_v62  ;;  %vm182_vm15 = vcmp.gt.f32.partialorder %v688_v13, %v668_v62 }
  0x94   :  { %vm183_vm0 = vcmp.gt.f32.partialorder %v690_v14, %v668_v62  ;;  %vm184_vm1 = vcmp.gt.f32.partialorder %v692_v15, %v668_v62  ;;  %v187_v40 = vsel %vm177_vm10, %v186_v10, 0.0  ;;  %v188_v41 = vsel %vm178_vm11, %v186_v10, 0.0 }
  0x95   :  { %v189_v42 = vsel %vm179_vm12, %v186_v10, 0.0  ;;  %v171_v43 = vadd.f32 %v163_v32, %v666_v59  ;;  %v172_v44 = vadd.f32 %v164_v33, %v666_v59  ;;  %v173_v45 = vadd.f32 %v165_v34, %v666_v59 }
  0x96   :  { %v190_v46 = vsel %vm180_vm13, %v186_v10, 0.0  ;;  %v174_v47 = vadd.f32 %v166_v35, %v666_v59  ;;  %v191_v48 = vsel %vm181_vm14, %v186_v10, 0.0  ;;  %v192_v49 = vsel %vm182_vm15, %v186_v10, 0.0 }
  0x97   :  { %v193_v50 = vsel %vm183_vm0, %v186_v10, 0.0  ;;  %v194_v51 = vsel %vm184_vm1, %v186_v10, 0.0  ;;  %v195_v52 = vadd.f32 %v187_v40, %v167_v36  ;;  %v196_v53 = vadd.f32 %v188_v41, %v168_v37 }
  0x98   :  { %v197_v54 = vadd.f32 %v189_v42, %v169_v38  ;;  %v198_v55 = vadd.f32 %v190_v46, %v170_v39  ;;  %vm205_vm2 = vcmp.gt.f32.partialorder %v678_v7, %v695_v16  ;;  %vm206_vm3 = vcmp.gt.f32.partialorder %v680_v8, %v695_v16 }
  0x99   :  { %vm207_vm4 = vcmp.gt.f32.partialorder %v682_v9, %v695_v16  ;;  %vm208_vm5 = vcmp.gt.f32.partialorder %v684_v11, %v695_v16  ;;  %vm209_vm6 = vcmp.gt.f32.partialorder %v686_v12, %v695_v16  ;;  %vm210_vm7 = vcmp.gt.f32.partialorder %v688_v13, %v695_v16 }
  0x9a   :  { %vm211_vm8 = vcmp.gt.f32.partialorder %v690_v14, %v695_v16  ;;  %v199_v56 = vadd.f32 %v191_v48, %v171_v43  ;;  %v200_v57 = vadd.f32 %v192_v49, %v172_v44  ;;  %v201_v58 = vadd.f32 %v193_v50, %v173_v45 }
  0x9b   :  { %vm212_vm9 = vcmp.gt.f32.partialorder %v692_v15, %v695_v16  ;;  %v202_v59 = vadd.f32 %v194_v51, %v174_v47  ;;  %v215_v60 = vsel %vm205_vm2, %v698_v17, 0.0  ;;  %v216_v61 = vsel %vm206_vm3, %v698_v17, 0.0 }
  0x9c   :  { %v217_v62 = vsel %vm207_vm4, %v698_v17, 0.0  ;;  %v218_v63 = vsel %vm208_vm5, %v698_v17, 0.0  ;;  %v219_v0 = vsel %vm209_vm6, %v698_v17, 0.0  ;;  %v220_v1 = vsel %vm210_vm7, %v698_v17, 0.0 }
  0x9d   :  { %v221_v2 = vsel %vm211_vm8, %v698_v17, 0.0  ;;  %v222_v3 = vsel %vm212_vm9, %v698_v17, 0.0  ;;  %vm233_vm10 = vcmp.gt.f32.partialorder %v678_v7, %v701_v18  ;;  %vm234_vm11 = vcmp.gt.f32.partialorder %v680_v8, %v701_v18 }
  0x9e   :  { %vm235_vm12 = vcmp.gt.f32.partialorder %v682_v9, %v701_v18  ;;  %v223_v4 = vadd.f32 %v215_v60, %v195_v52  ;;  %v224_v5 = vadd.f32 %v216_v61, %v196_v53  ;;  %v225_v6 = vadd.f32 %v217_v62, %v197_v54 }
  0x9f   :  { %vm236_vm13 = vcmp.gt.f32.partialorder %v684_v11, %v701_v18  ;;  %v226_v10 = vadd.f32 %v218_v63, %v198_v55  ;;  %vm237_vm14 = vcmp.gt.f32.partialorder %v686_v12, %v701_v18  ;;  %vm238_vm15 = vcmp.gt.f32.partialorder %v688_v13, %v701_v18 }
  0xa0   :  { %vm239_vm0 = vcmp.gt.f32.partialorder %v690_v14, %v701_v18  ;;  %vm240_vm1 = vcmp.gt.f32.partialorder %v692_v15, %v701_v18  ;;  %v243_v16 = vsel %vm233_vm10, %v704_v19, 0.0  ;;  %v244_v17 = vsel %vm234_vm11, %v704_v19, 0.0 }
  0xa1   :  { %v245_v27 = vsel %vm235_vm12, %v704_v19, 0.0  ;;  %v227_v28 = vadd.f32 %v219_v0, %v199_v56  ;;  %v228_v29 = vadd.f32 %v220_v1, %v200_v57  ;;  %v229_v31 = vadd.f32 %v221_v2, %v201_v58 }
  0xa2   :  { %v246_v32 = vsel %vm236_vm13, %v704_v19, 0.0  ;;  %v230_v33 = vadd.f32 %v222_v3, %v202_v59  ;;  %v247_v34 = vsel %vm237_vm14, %v704_v19, 0.0  ;;  %v248_v35 = vsel %vm238_vm15, %v704_v19, 0.0 }
  0xa3   :  { %v249_v36 = vsel %vm239_vm0, %v704_v19, 0.0  ;;  %v250_v18 = vsel %vm240_vm1, %v704_v19, 0.0  ;;  %v251_v37 = vadd.f32 %v243_v16, %v223_v4  ;;  %v252_v38 = vadd.f32 %v244_v17, %v224_v5 }
  0xa4   :  { %v253_v39 = vadd.f32 %v245_v27, %v225_v6  ;;  %v254_v40 = vadd.f32 %v246_v32, %v226_v10  ;;  %vm261_vm2 = vcmp.gt.f32.partialorder %v678_v7, %v707_v20  ;;  %vm262_vm3 = vcmp.gt.f32.partialorder %v680_v8, %v707_v20 }
  0xa5   :  { %vm263_vm4 = vcmp.gt.f32.partialorder %v682_v9, %v707_v20  ;;  %vm264_vm5 = vcmp.gt.f32.partialorder %v684_v11, %v707_v20  ;;  %vm265_vm6 = vcmp.gt.f32.partialorder %v686_v12, %v707_v20  ;;  %vm266_vm7 = vcmp.gt.f32.partialorder %v688_v13, %v707_v20 }
  0xa6   :  { %vm267_vm8 = vcmp.gt.f32.partialorder %v690_v14, %v707_v20  ;;  %v255_v19 = vadd.f32 %v247_v34, %v227_v28  ;;  %v256_v41 = vadd.f32 %v248_v35, %v228_v29  ;;  %v257_v42 = vadd.f32 %v249_v36, %v229_v31 }
  0xa7   :  { %vm268_vm9 = vcmp.gt.f32.partialorder %v692_v15, %v707_v20  ;;  %v258_v43 = vadd.f32 %v250_v18, %v230_v33  ;;  %v271_v44 = vsel %vm261_vm2, %v710_v21, 0.0  ;;  %v272_v45 = vsel %vm262_vm3, %v710_v21, 0.0 }
  0xa8   :  { %v273_v46 = vsel %vm263_vm4, %v710_v21, 0.0  ;;  %v274_v47 = vsel %vm264_vm5, %v710_v21, 0.0  ;;  %v275_v48 = vsel %vm265_vm6, %v710_v21, 0.0  ;;  %v276_v49 = vsel %vm266_vm7, %v710_v21, 0.0 }
  0xa9   :  { %v277_v50 = vsel %vm267_vm8, %v710_v21, 0.0  ;;  %v278_v51 = vsel %vm268_vm9, %v710_v21, 0.0  ;;  %vm289_vm10 = vcmp.gt.f32.partialorder %v678_v7, %v713_v22  ;;  %vm290_vm11 = vcmp.gt.f32.partialorder %v680_v8, %v713_v22 }
  0xaa   :  { %vm291_vm12 = vcmp.gt.f32.partialorder %v682_v9, %v713_v22  ;;  %v279_v20 = vadd.f32 %v271_v44, %v251_v37  ;;  %v280_v52 = vadd.f32 %v272_v45, %v252_v38  ;;  %v281_v53 = vadd.f32 %v273_v46, %v253_v39 }
  0xab   :  { %vm292_vm13 = vcmp.gt.f32.partialorder %v684_v11, %v713_v22  ;;  %v282_v54 = vadd.f32 %v274_v47, %v254_v40  ;;  %v283_v55 = vadd.f32 %v275_v48, %v255_v19  ;;  %v284_v56 = vadd.f32 %v276_v49, %v256_v41 }
  0xac   :  { %vm293_vm14 = vcmp.gt.f32.partialorder %v686_v12, %v713_v22  ;;  %v285_v21 = vadd.f32 %v277_v50, %v257_v42  ;;  %v299_v57 = vsel %vm289_vm10, %v719_v23, 0.0  ;;  %v300_v58 = vsel %vm290_vm11, %v719_v23, 0.0 }
  0xad   :  { %v301_v59 = vsel %vm291_vm12, %v719_v23, 0.0  ;;  %vm294_vm15 = vcmp.gt.f32.partialorder %v688_v13, %v713_v22  ;;  %vm295_vm0 = vcmp.gt.f32.partialorder %v690_v14, %v713_v22  ;;  %vm296_vm1 = vcmp.gt.f32.partialorder %v692_v15, %v713_v22 }
  0xae   :  { %v302_v60 = vsel %vm292_vm13, %v719_v23, 0.0  ;;  %v303_v61 = vsel %vm293_vm14, %v719_v23, 0.0  ;;  %vm317_vm2 = vcmp.gt.f32.partialorder %v678_v7, %v727_v24  ;;  %vm318_vm3 = vcmp.gt.f32.partialorder %v680_v8, %v727_v24 }
  0xaf   :  { %vm319_vm4 = vcmp.gt.f32.partialorder %v682_v9, %v727_v24  ;;  %v307_v62 = vadd.f32 %v299_v57, %v279_v20  ;;  %v308_v63 = vadd.f32 %v300_v58, %v280_v52  ;;  %v309_v0 = vadd.f32 %v301_v59, %v281_v53 }
  0xb0   :  { %vm320_vm5 = vcmp.gt.f32.partialorder %v684_v11, %v727_v24  ;;  %vm321_vm6 = vcmp.gt.f32.partialorder %v686_v12, %v727_v24  ;;  %v327_v1 = vsel %vm317_vm2, %v730_v25, 0.0  ;;  %v328_v2 = vsel %vm318_vm3, %v730_v25, 0.0 }
  0xb1   :  { %v329_v3 = vsel %vm319_vm4, %v730_v25, 0.0  ;;  %v286_v4 = vadd.f32 %v278_v51, %v258_v43  ;;  %v304_v5 = vsel %vm294_vm15, %v719_v23, 0.0  ;;  %v305_v6 = vsel %vm295_vm0, %v719_v23, 0.0 }
  0xb2   :  { %v310_v10 = vadd.f32 %v302_v60, %v282_v54  ;;  %v306_v16 = vsel %vm296_vm1, %v719_v23, 0.0  ;;  %v311_v17 = vadd.f32 %v303_v61, %v283_v55  ;;  %vm322_vm7 = vcmp.gt.f32.partialorder %v688_v13, %v727_v24 }
  0xb3   :  { %v330_v27 = vsel %vm320_vm5, %v730_v25, 0.0  ;;  %v331_v28 = vsel %vm321_vm6, %v730_v25, 0.0  ;;  %v335_v29 = vadd.f32 %v327_v1, %v307_v62  ;;  %v336_v31 = vadd.f32 %v328_v2, %v308_v63 }
  0xb4   :  { %v337_v32 = vadd.f32 %v329_v3, %v309_v0  ;;  %vm345_vm8 = vcmp.gt.f32.partialorder %v678_v7, %v733_v26  ;;  %vm346_vm9 = vcmp.gt.f32.partialorder %v680_v8, %v733_v26  ;;  %vm347_vm10 = vcmp.gt.f32.partialorder %v682_v9, %v733_v26 }
  0xb5   :  { %vm348_vm11 = vcmp.gt.f32.partialorder %v684_v11, %v733_v26  ;;  %v312_v22 = vadd.f32 %v304_v5, %v284_v56  ;;  %v313_v23 = vadd.f32 %v305_v6, %v285_v21  ;;  %vm323_vm12 = vcmp.gt.f32.partialorder %v690_v14, %v727_v24 }
  0xb6   :  { %v338_v33 = vadd.f32 %v330_v27, %v310_v10  ;;  %vm349_vm13 = vcmp.gt.f32.partialorder %v686_v12, %v733_v26  ;;  %v355_v7 = vsel %vm345_vm8, %v736_v30, 0.0  ;;  %v356_v34 = vsel %vm346_vm9, %v736_v30, 0.0 }
  0xb7   :  { %v357_v8 = vsel %vm347_vm10, %v736_v30, 0.0  ;;  %vm324_vm14 = vcmp.gt.f32.partialorder %v692_v15, %v727_v24  ;;  %v332_v9 = vsel %vm322_vm7, %v730_v25, 0.0  ;;  %v339_v11 = vadd.f32 %v331_v28, %v311_v17 }
  0xb8   :  { %v358_v35 = vsel %vm348_vm11, %v736_v30, 0.0  ;;  %vm350_vm15 = vcmp.gt.f32.partialorder %v688_v13, %v733_v26  ;;  %v363_v12 = vadd.f32 %v355_v7, %v335_v29  ;;  %v364_v36 = vadd.f32 %v356_v34, %v336_v31 }
  0xb9   :  { %v365_v18 = vadd.f32 %v357_v8, %v337_v32  ;;  %v314_v37 = vadd.f32 %v306_v16, %v286_v4  ;;  %v333_v38 = vsel %vm323_vm12, %v730_v25, 0.0  ;;  %v359_v39 = vsel %vm349_vm13, %v736_v30, 0.0 }
  0xba   :  { %v340_v40 = vadd.f32 %v332_v9, %v312_v22  ;;  %vm351_vm0 = vcmp.gt.f32.partialorder %v690_v14, %v733_v26  ;;  %v366_v24 = vadd.f32 %v358_v35, %v338_v33  ;;  %v371_v19 = vadd.f32 %v364_v36, %v363_v12 }
  0xbb   :  { %v334_v41 = vsel %vm324_vm14, %v730_v25, 0.0  ;;  %v360_v42 = vsel %vm350_vm15, %v736_v30, 0.0  ;;  %v341_v43 = vadd.f32 %v333_v38, %v313_v23  ;;  %vm352_vm1 = vcmp.gt.f32.partialorder %v692_v15, %v733_v26 }
  0xbc   :  { %v367_v13 = vadd.f32 %v359_v39, %v339_v11  ;;  %v372_v44 = vadd.f32 %v371_v19, %v365_v18  ;;  %v361_v45 = vsel %vm351_vm0, %v736_v30, 0.0  ;;  %v342_v46 = vadd.f32 %v334_v41, %v314_v37 }
  0xbd   :  { %v368_v47 = vadd.f32 %v360_v42, %v340_v40  ;;  %v362_v49 = vsel %vm352_vm1, %v736_v30, 0.0  ;;  %v369_v14 = vadd.f32 %v361_v45, %v341_v43 }
  0xbe   :  { %v373_v48 = vadd.f32 %v372_v44, %v366_v24  ;;  %v370_v51 = vadd.f32 %v362_v49, %v342_v46 }
  0xc0   :  { %v374_v50 = vadd.f32 %v373_v48, %v367_v13 }
  0xc2   :  { %v375_v20 = vadd.f32 %v374_v50, %v368_v47 }
  0xc4   :  { %v376_v25 = vadd.f32 %v375_v20, %v369_v14 }
  0xc6   :  { %v377_v52 = vadd.f32 %v376_v25, %v370_v51 }
  0xc8   :  { %v378_v53 = vrot.slane %v377_v52, 4 }
  0xca   :  { %v379_v54 = vadd.f32 %v378_v53, %v377_v52 }
  0xcc   :  { %v380_v55 = vrot.slane %v379_v54, 2 }
  0xce   :  { %v381_v56 = vadd.f32 %v380_v55, %v379_v54 }
  0xd0   :  { %v382_v15 = vrot.slane %v381_v56, 1 }
  0xd2   :  { %v383_v26 = vadd.f32 %v382_v15, %v381_v56 }
  0xd4   :  { %v384_v21 = vmul.f32 0.015625, %v383_v26 }
  0xd6   :  { %v385_v57 = vsub.f32 %v363_v12, %v384_v21  ;;  %v386_v58 = vsub.f32 %v364_v36, %v384_v21  ;;  %v387_v59 = vsub.f32 %v365_v18, %v384_v21  ;;  %v388_v60 = vsub.f32 %v366_v24, %v384_v21 }
  0xd7   :  { %v389_v61 = vsub.f32 %v367_v13, %v384_v21  ;;  %v390_v0 = vsub.f32 %v368_v47, %v384_v21  ;;  %v391_v3 = vsub.f32 %v369_v14, %v384_v21  ;;  %v392_v6 = vsub.f32 %v370_v51, %v384_v21 }
  0xd8   :  { %v393_v62 = vmul.f32 %v385_v57, %v385_v57  ;;  %v394_v30 = vmul.f32 %v386_v58, %v386_v58  ;;  %v395_v63 = vmul.f32 %v387_v59, %v387_v59  ;;  %v396_v1 = vmul.f32 %v388_v60, %v388_v60 }
  0xd9   :  { %v397_v4 = vmul.f32 %v389_v61, %v389_v61  ;;  %v398_v10 = vmul.f32 %v390_v0, %v390_v0  ;;  %v399_v17 = vmul.f32 %v391_v3, %v391_v3  ;;  %v400_v28 = vmul.f32 %v392_v6, %v392_v6 }
  0xda   :  { %v401_v2 = vadd.f32 %v394_v30, %v393_v62 }
  0xdc   :  { %v402_v5 = vadd.f32 %v401_v2, %v395_v63 }
  0xde   :  { %v403_v16 = vadd.f32 %v402_v5, %v396_v1 }
  0xe0   :  { %v404_v27 = vadd.f32 %v403_v16, %v397_v4 }
  0xe2   :  { %v405_v29 = vadd.f32 %v404_v27, %v398_v10 }
  0xe4   :  { %v406_v31 = vadd.f32 %v405_v29, %v399_v17 }
  0xe6   :  { %v407_v32 = vadd.f32 %v406_v31, %v400_v28 }
  0xe8   :  { %v408_v22 = vrot.slane %v407_v32, 4 }
  0xea   :  { %v409_v23 = vadd.f32 %v408_v22, %v407_v32 }
  0xec   :  { %v410_v33 = vrot.slane %v409_v23, 2 }
  0xee   :  { %v411_v7 = vadd.f32 %v410_v33, %v409_v23 }
  0xf0   :  { %v412_v34 = vrot.slane %v411_v7, 1 }
  0xf2   :  { %v413_v8 = vadd.f32 %v412_v34, %v411_v7 }
  0xf4   :  { %v414_v9 = vmul.f32 0.015873017, %v413_v8 }
  0xf6   :  { %515 = vrsqrt.f32 %v414_v9  ;;  %vm417_vm2 = vcmp.eq.f32.partialorder %v414_v9, inf  ;;  %v420_v35 = vand.u32 2147483648, %v414_v9  ;;  %vm419_vm3 = vcmp.eq.f32.partialorder %v414_v9, 0.0 }
 0x100   :  { %v516_v11 = vpop.eup %515 }
 0x101   :  { %v416_v12 = vmul.f32 %v516_v11, %v414_v9 }
 0x103   :  { %v418_v36 = vsel %vm417_vm2, %v414_v9, %v416_v12 }
 0x104   :  { %v421_v18 = vsel %vm419_vm3, %v420_v35, %v418_v36 }
 0x105   :  { %v422_v37 = vadd.f32 1e-06, %v421_v18 }
 0x107   :  { %517 = vrcp.f32 %v422_v37 }
 0x111   :  { %v518_v38 = vpop.eup %517 }
 0x112   :  { %v424_v39 = vmul.f32 %v518_v38, %v385_v57  ;;  %v425_v40 = vmul.f32 %v518_v38, %v386_v58  ;;  %v426_v24 = vmul.f32 %v518_v38, %v387_v59  ;;  %v427_v19 = vmul.f32 %v518_v38, %v388_v60 }
 0x113   :  { %v428_v41 = vmul.f32 %v518_v38, %v389_v61  ;;  %v429_v42 = vmul.f32 %v518_v38, %v390_v0  ;;  %v430_v43 = vmul.f32 %v518_v38, %v391_v3  ;;  %v431_v13 = vmul.f32 %v518_v38, %v392_v6 }
 0x114   :  { %v497_v44 = vclamps-f32 %v424_v39, 100.0  ;;  %v498_v45 = vclamps-f32 %v425_v40, 100.0  ;;  %v499_v46 = vclamps-f32 %v426_v24, 100.0  ;;  %v500_v47 = vclamps-f32 %v427_v19, 100.0 }
 0x115   :  { %v501_v48 = vclamps-f32 %v428_v41, 100.0  ;;  %v502_v49 = vclamps-f32 %v429_v42, 100.0  ;;  %v503_v14 = vclamps-f32 %v430_v43, 100.0  ;;  %v504_v50 = vclamps-f32 %v431_v13, 100.0 }
 0x116   :  { %448 = vst [vmem:[#allocation10] sm:$0xff] %v497_v44  ;;  %449 = vst [vmem:[#allocation10 + $0x8] sm:$0xff] %v498_v45 }
 0x117   :  { %450 = vst [vmem:[#allocation10 + $0x10] sm:$0xff] %v499_v46  ;;  %451 = vst [vmem:[#allocation10 + $0x18] sm:$0xff] %v500_v47 }
 0x118   :  { %452 = vst [vmem:[#allocation10 + $0x20] sm:$0xff] %v501_v48  ;;  %453 = vst [vmem:[#allocation10 + $0x28] sm:$0xff] %v502_v49 }
 0x119   :  { %454 = vst [vmem:[#allocation10 + $0x30] sm:$0xff] %v503_v14  ;;  %455 = vst [vmem:[#allocation10 + $0x38] sm:$0xff] %v504_v50 }
 0x11a   :  { %576 = shalt.err (!%p573_p8)
}
 0x11b   :  { %s577_s30 = scalar_lea.hbm %s937_s4, 1024 }
 0x11c   :  { %p578_p9 = scmp.ne.s32.totalorder %s937_s4, %s577_s30  ;;  %p581_p10 = scmp.lt.u32.totalorder %s577_s30, %s937_s4 }
 0x11e   :  { %p583_p11 = pnand %p581_p10, %p578_p9 }
 0x120   :  { %586 = shalt.err (!%p583_p11)
}
 0x121   :  { %467 = dma.vmem_to_hbm [thread:$0]  %s462_s26, 1024, %s937_s4, [#allocation5], %s598_s7, %s598_s7, %s599_s8  }
 0x122   :  { %593 = dma.done.wait [#allocation5], 1024  }
 0x123   :  { %594 = vsyncadd [#allocation5], 4294966272 }
 0x124   :  { %471 = vsyncpa [#allocation4], 1 }
 0x125   :  { %472 = vsyncpa [#allocation5], 1 }
 0x126   :  { %473 = vsyncpa [#allocation6], 1 }
 0x127   :  { %474 = vsyncpa [#allocation8], 1 }

</bundles_post_ra>
